<compile_context>
chip_gen: v7x
topology: tpu7x:2x2x1
jax: 0.10.0
libtpu: 0.0.40
codegen_flags: <defaults>
</compile_context>

<pallas_src>
import math
from functools import partial

import jax
import jax.numpy as jnp
from jax.experimental import pallas as pl
from jax.experimental.pallas import tpu as pltpu


def _round_up(x, m):
    return ((x + m - 1) // m) * m


def critic_kernel(x_ref, w1_ref, b1_ref, w2_ref, b2_ref, o_ref):
    # fc1: x @ W1 + b1, then ReLU (bias add / ReLU stay in f32 -> v5e safe).
    h = jnp.dot(x_ref[...], w1_ref[...], preferred_element_type=jnp.float32)
    h = jnp.maximum(h + b1_ref[...], 0.0)          # b1_ref is (1, H_pad)
    # fc2: h @ W2 + b2  (feed h in the matmul operand dtype, f32 accumulate).
    out = jnp.dot(h.astype(w2_ref.dtype), w2_ref[...],
                  preferred_element_type=jnp.float32)
    o_ref[...] = (out + b2_ref[...]).astype(o_ref.dtype)


@partial(jax.jit, static_argnames=("matmul_dtype",))
def critic_forward(x, w1, b1, w2, b2, *, matmul_dtype=None):
    """x: [B, input_dim]; w1: [input_dim, hidden]; b1: [hidden];
    w2: [hidden, output_dim]; b2: [output_dim].

    matmul_dtype: optional dtype (e.g. jnp.bfloat16) for the MXU operands on
    v6e/v7x. Accumulation is always f32; default keeps the input dtype.
    """
    B, in_dim = x.shape
    hidden = w1.shape[1]
    out_dim = w2.shape[1]

    # ---- lane-pad hidden / output dims to multiples of 128 (zero padding
    # is mathematically inert; padded output lanes are exactly 0). ----
    H_pad = _round_up(hidden, 128)
    OUT_pad = _round_up(out_dim, 128)

    w1_p = jnp.zeros((in_dim, H_pad), w1.dtype).at[:, :hidden].set(w1)
    b1_p = jnp.zeros((1, H_pad), b1.dtype).at[0, :hidden].set(b1)
    w2_p = jnp.zeros((H_pad, OUT_pad), w2.dtype).at[:hidden, :out_dim].set(w2)
    b2_p = jnp.zeros((1, OUT_pad), b2.dtype).at[0, :out_dim].set(b2)

    # ---- batch tiling: pick a 512-row tile when B is large, otherwise the
    # (8-rounded) batch itself; pad B so the grid divides evenly. ----
    TB = min(512, _round_up(B, 8))
    B_pad = _round_up(B, TB)
    x_p = x if B_pad == B else jnp.zeros((B_pad, in_dim), x.dtype).at[:B].set(x)

    if matmul_dtype is not None:
        x_p = x_p.astype(matmul_dtype)
        w1_p = w1_p.astype(matmul_dtype)
        w2_p = w2_p.astype(matmul_dtype)

    grid = (B_pad // TB,)

    flops = 2 * B * (in_dim * hidden + hidden * out_dim)
    bytes_accessed = 4 * (B_pad * in_dim + in_dim * H_pad + H_pad
                          + H_pad * OUT_pad + OUT_pad + B_pad * OUT_pad)

    out_padded = pl.pallas_call(
        critic_kernel,
        out_shape=jax.ShapeDtypeStruct((B_pad, OUT_pad), x.dtype),
        grid=grid,
        in_specs=[
            pl.BlockSpec((TB, in_dim), lambda i: (i, 0)),     # x tile
            pl.BlockSpec((in_dim, H_pad), lambda i: (0, 0)),  # W1 (resident)
            pl.BlockSpec((1, H_pad), lambda i: (0, 0)),       # b1
            pl.BlockSpec((H_pad, OUT_pad), lambda i: (0, 0)), # W2 (resident)
            pl.BlockSpec((1, OUT_pad), lambda i: (0, 0)),     # b2
        ],
        out_specs=pl.BlockSpec((TB, OUT_pad), lambda i: (i, 0)),
        compiler_params=pltpu.CompilerParams(
            dimension_semantics=("parallel",)),               # megacore on v7x
        cost_estimate=pl.CostEstimate(flops=flops,
                                      transcendentals=0,
                                      bytes_accessed=bytes_accessed),
    )(x_p, w1_p, b1_p, w2_p, b2_p)

    # Slice away batch/lane padding outside the kernel.
    return out_padded[:B, :out_dim]


def init_linear_params(key, in_features, out_features, dtype=jnp.float32):
    """Deterministic init mimicking torch.nn.Linear (uniform +-1/sqrt(fan_in)).
    Returns W pre-transposed as [in_features, out_features]."""
    k_w, k_b = jax.random.split(key)
    bound = 1.0 / math.sqrt(in_features)
    w = jax.random.uniform(k_w, (in_features, out_features),
                           dtype=dtype, minval=-bound, maxval=bound)
    b = jax.random.uniform(k_b, (out_features,),
                           dtype=dtype, minval=-bound, maxval=bound)
    return w, b


if __name__ == "__main__":
    # critic(input_dim, output_dim, hidden_dim)
    batch, input_dim, hidden_dim, output_dim = 8, 32, 64, 4

    key = jax.random.PRNGKey(0)
    k_x, k_fc1, k_fc2 = jax.random.split(key, 3)

    x = jax.random.normal(k_x, (batch, input_dim), dtype=jnp.float32)
    w1, b1 = init_linear_params(k_fc1, input_dim, hidden_dim)
    w2, b2 = init_linear_params(k_fc2, hidden_dim, output_dim)

    out = critic_forward(x, w1, b1, w2, b2)
    jax.block_until_ready(out)

    # Reference check in plain JAX (same math as the PyTorch module).
    ref = jnp.maximum(x @ w1 + b1, 0.0) @ w2 + b2
    assert out.shape == (batch, output_dim)
    assert jnp.allclose(out, ref, atol=1e-5, rtol=1e-5)

    # Optional bf16-operand path (v6e/v7x MXU); looser tolerance.
    out_bf16 = critic_forward(x, w1, b1, w2, b2, matmul_dtype=jnp.bfloat16)
    jax.block_until_ready(out_bf16)
    assert jnp.allclose(out_bf16, ref, atol=5e-2, rtol=5e-2)

    print("KERNEL_OK")
</pallas_src>

<mosaic_0001>
module attributes {stable_mosaic.version = 11 : i64} {
  func.func @critic_kernel(%arg0: i32, %arg1: memref<8x32xf32, #tpu.memory_space<vmem>>, %arg2: memref<32x128xf32, #tpu.memory_space<vmem>>, %arg3: memref<1x128xf32, #tpu.memory_space<vmem>>, %arg4: memref<128x128xf32, #tpu.memory_space<vmem>>, %arg5: memref<1x128xf32, #tpu.memory_space<vmem>>, %arg6: memref<8x128xf32, #tpu.memory_space<vmem>>) attributes {dimension_semantics = [#tpu.dimension_semantics<parallel>], iteration_bounds = array<i64: 1>, scalar_prefetch = 0 : i64, scratch_operands = 0 : i64, tpu.core_type = #tpu.core_type<tc>, window_params = [{transform_indices = @transform_0, window_bounds = array<i64: 8, 32>}, {pipeline_mode = #tpu.pipeline_mode<synchronous>, transform_indices = @transform_1, window_bounds = array<i64: 32, 128>}, {pipeline_mode = #tpu.pipeline_mode<synchronous>, transform_indices = @transform_2, window_bounds = array<i64: 1, 128>}, {pipeline_mode = #tpu.pipeline_mode<synchronous>, transform_indices = @transform_3, window_bounds = array<i64: 128, 128>}, {pipeline_mode = #tpu.pipeline_mode<synchronous>, transform_indices = @transform_4, window_bounds = array<i64: 1, 128>}, {transform_indices = @transform_5, window_bounds = array<i64: 8, 128>}]} {
    %c0 = arith.constant 0 : index
    %c0_0 = arith.constant 0 : index
    %0 = vector.load %arg1[%c0, %c0_0] : memref<8x32xf32, #tpu.memory_space<vmem>>, vector<8x32xf32>
    %c0_1 = arith.constant 0 : index
    %c0_2 = arith.constant 0 : index
    %1 = vector.load %arg2[%c0_1, %c0_2] : memref<32x128xf32, #tpu.memory_space<vmem>>, vector<32x128xf32>
    %cst = arith.constant dense<0.000000e+00> : vector<8x128xf32>
    %2 = tpu.matmul %0, %1, %cst {dimension_numbers = #tpu.dot_dimension_numbers<[1], [0], [0], [1], [0, 0, 1, 1], [], []>} : vector<8x32xf32>, vector<32x128xf32>, vector<8x128xf32> -> vector<8x128xf32>
    %c0_3 = arith.constant 0 : index
    %c0_4 = arith.constant 0 : index
    %3 = vector.load %arg3[%c0_3, %c0_4] : memref<1x128xf32, #tpu.memory_space<vmem>>, vector<1x128xf32>
    %4 = vector.broadcast %3 : vector<1x128xf32> to vector<8x128xf32>
    %5 = arith.addf %2, %4 : vector<8x128xf32>
    %cst_5 = arith.constant 0.000000e+00 : f32
    %6 = vector.broadcast %cst_5 : f32 to vector<8x128xf32>
    %7 = arith.maximumf %5, %6 : vector<8x128xf32>
    %c0_6 = arith.constant 0 : index
    %c0_7 = arith.constant 0 : index
    %8 = vector.load %arg4[%c0_6, %c0_7] : memref<128x128xf32, #tpu.memory_space<vmem>>, vector<128x128xf32>
    %cst_8 = arith.constant dense<0.000000e+00> : vector<8x128xf32>
    %9 = tpu.matmul %7, %8, %cst_8 {dimension_numbers = #tpu.dot_dimension_numbers<[1], [0], [0], [1], [0, 0, 1, 1], [], []>} : vector<8x128xf32>, vector<128x128xf32>, vector<8x128xf32> -> vector<8x128xf32>
    %c0_9 = arith.constant 0 : index
    %c0_10 = arith.constant 0 : index
    %10 = vector.load %arg5[%c0_9, %c0_10] : memref<1x128xf32, #tpu.memory_space<vmem>>, vector<1x128xf32>
    %11 = vector.broadcast %10 : vector<1x128xf32> to vector<8x128xf32>
    %12 = arith.addf %9, %11 : vector<8x128xf32>
    %c0_11 = arith.constant 0 : index
    %c0_12 = arith.constant 0 : index
    %13 = vector.load %arg6[%c0_11, %c0_12] : memref<8x128xf32, #tpu.memory_space<vmem>>, vector<8x128xf32>
    tpu.vector_store %arg6[%c0_11, %c0_12], %12 {strides = array<i32>} : memref<8x128xf32, #tpu.memory_space<vmem>>, vector<8x128xf32>,
    return
  }
  func.func @transform_0(%arg0: i32) -> (i32, i32) {
    %c0_i32 = arith.constant 0 : i32
    %c0_i32_0 = arith.constant 0 : i32
    return %arg0, %c0_i32 : i32, i32
  }
  func.func @transform_1(%arg0: i32) -> (i32, i32) {
    %c0_i32 = arith.constant 0 : i32
    %c0_i32_0 = arith.constant 0 : i32
    %c0_i32_1 = arith.constant 0 : i32
    return %c0_i32, %c0_i32_0 : i32, i32
  }
  func.func @transform_2(%arg0: i32) -> (i32, i32) {
    %c0_i32 = arith.constant 0 : i32
    %c0_i32_0 = arith.constant 0 : i32
    %c0_i32_1 = arith.constant 0 : i32
    return %c0_i32, %c0_i32_0 : i32, i32
  }
  func.func @transform_3(%arg0: i32) -> (i32, i32) {
    %c0_i32 = arith.constant 0 : i32
    %c0_i32_0 = arith.constant 0 : i32
    %c0_i32_1 = arith.constant 0 : i32
    return %c0_i32, %c0_i32_0 : i32, i32
  }
  func.func @transform_4(%arg0: i32) -> (i32, i32) {
    %c0_i32 = arith.constant 0 : i32
    %c0_i32_0 = arith.constant 0 : i32
    %c0_i32_1 = arith.constant 0 : i32
    return %c0_i32, %c0_i32_0 : i32, i32
  }
  func.func @transform_5(%arg0: i32) -> (i32, i32) {
    %c0_i32 = arith.constant 0 : i32
    %c0_i32_0 = arith.constant 0 : i32
    return %arg0, %c0_i32 : i32, i32
  }
}

</mosaic_0001>

<bundles_post_ra>
// kernel: critic_forward.1
= control target key start
LH: loop header
LB: loop body
LE: loop exit
PB: predicated region body
PF: predicated region fallthrough
CT: control target
= control target key end

     0   :  { %v309_v0 = vmov 0.0|0.0   ;;  %vm310_vm0 = vmmov 0   ;;  %v311_v4 = vmov 0.0   ;;  %vm32_vm1 = vcmask 261120   ;;  %s414_s1 = inlined_call_operand.vmem [shape: f32[32,128], index: 1, kind: input, shape index: {}]   ;;  %s415_s3 = inlined_call_operand.vmem [shape: f32[128,128], index: 3, kind: input, shape index: {}]   ;;  %s416_s0 = inlined_call_operand.vmem [shape: f32[8,32], index: 0, kind: input, shape index: {}]   ;;  %s417_s2 = inlined_call_operand.vmem [shape: f32[1,128], index: 2, kind: input, shape index: {}]   ;;  %s418_s4 = inlined_call_operand.vmem [shape: f32[1,128], index: 4, kind: input, shape index: {}]   ;;  %s419_s5 = inlined_call_operand.vmem [shape: f32[8,128], index: 5, kind: output, shape index: {}]  }
   0x1   :  { %276 = vmatprep.subr.bf16.mxu0 %v309_v0  ;;  %v21_v1 = vld [vmem:[%s414_s1] sm:$0xff]  ;;  %v22_v2 = vld [vmem:[%s414_s1 + $0x8] sm:$0xff]  ;;  %v23_v3 = vld [vmem:[%s414_s1 + $0x10] sm:$0xff]  ;;  %238 = vmatprep.mubr.msk.f32.mxu0 %vm310_vm0, %v311_v4 }
   0x2   :  { %v277_v5 = vpack.c.bf16 %v22_v2, %v21_v1  ;;  %v24_v6 = vld [vmem:[%s414_s1 + $0x18] sm:$0xff]  ;;  %282 = vmatprep.subr.bf16.mxu1 %v309_v0  ;;  %v107_v7 = vld [vmem:[%s415_s3] sm:$0xff]  ;;  %273 = vmatprep.mubr.msk.f32.mxu1 %vm310_vm0, %v311_v4  ;;  %v108_v8 = vld [vmem:[%s415_s3 + $0x8] sm:$0xff] }
   0x3   :  { %v109_v9 = vld [vmem:[%s415_s3 + $0x10] sm:$0xff]  ;;  %v110_v10 = vld [vmem:[%s415_s3 + $0x18] sm:$0xff]  ;;  %v280_v11 = vpack.c.bf16 %v24_v6, %v23_v3  ;;  %v283_v12 = vpack.c.bf16 %v108_v8, %v107_v7  ;;  %v111_v14 = vld [vmem:[%s415_s3 + $0x20] sm:$0xff] }
   0x4   :  { %278 = vmatpush3.bf16.msra.mxu0 %v277_v5  ;;  %v286_v13 = vpack.c.bf16 %v110_v10, %v109_v9  ;;  %v112_v15 = vld [vmem:[%s415_s3 + $0x28] sm:$0xff]  ;;  %v20_v16 = vld [vmem:[%s416_s0] sm:$0xff]  ;;  %v113_v18 = vld [vmem:[%s415_s3 + $0x30] sm:$0xff] }
   0x5   :  { %279 = vmatprep.subr.bf16.mxu0 %v309_v0  ;;  %284 = vmatpush3.bf16.msra.mxu1 %v283_v12  ;;  %v289_v17 = vpack.c.bf16 %v112_v15, %v111_v14  ;;  %v114_v19 = vld [vmem:[%s415_s3 + $0x38] sm:$0xff]  ;;  %v115_v21 = vld [vmem:[%s415_s3 + $0x40] sm:$0xff]  ;;  %v116_v22 = vld [vmem:[%s415_s3 + $0x48] sm:$0xff] }
   0x6   :  { %285 = vmatprep.subr.bf16.mxu1 %v309_v0  ;;  %v292_v20 = vpack.c.bf16 %v114_v19, %v113_v18  ;;  %v295_v23 = vpack.c.bf16 %v116_v22, %v115_v21  ;;  %v117_v24 = vld [vmem:[%s415_s3 + $0x50] sm:$0xff]  ;;  %v118_v25 = vld [vmem:[%s415_s3 + $0x58] sm:$0xff]  ;;  %v119_v27 = vld [vmem:[%s415_s3 + $0x60] sm:$0xff] }
   0x7   :  { %v298_v26 = vpack.c.bf16 %v118_v25, %v117_v24  ;;  %v120_v28 = vld [vmem:[%s415_s3 + $0x68] sm:$0xff]  ;;  %v121_v30 = vld [vmem:[%s415_s3 + $0x70] sm:$0xff]  ;;  %v122_v31 = vld [vmem:[%s415_s3 + $0x78] sm:$0xff] }
   0x8   :  { %281 = vmatpush3.bf16.msra.mxu0 %v280_v11  ;;  %v301_v29 = vpack.c.bf16 %v120_v28, %v119_v27  ;;  %v304_v32 = vpack.c.bf16 %v122_v31, %v121_v30  ;;  %v205_v33 = vld [vmem:[%s417_s2] ss:$0 sm:$0xff] }
   0x9   :  { %287 = vmatpush3.bf16.msra.mxu1 %v286_v13  ;;  %v207_v38 = vld [vmem:[%s418_s4] ss:$0 sm:$0xff] }
   0xa   :  { %288 = vmatprep.subr.bf16.mxu1 %v309_v0 }
   0xb   :  { %239 = vmatmul.mubr.msk.f32.vlgmr.msra.gmra.mrb[0].mxu0 %vm32_vm1, %v20_v16 }
   0xd   :  { %290 = vmatpush3.bf16.msra.mxu1 %v289_v17 }
   0xe   :  { %291 = vmatprep.subr.bf16.mxu1 %v309_v0 }
  0x11   :  { %293 = vmatpush3.bf16.msra.mxu1 %v292_v20 }
  0x12   :  { %294 = vmatprep.subr.bf16.mxu1 %v309_v0 }
  0x15   :  { %296 = vmatpush3.bf16.msra.mxu1 %v295_v23 }
  0x16   :  { %297 = vmatprep.subr.bf16.mxu1 %v309_v0 }
  0x19   :  { %299 = vmatpush3.bf16.msra.mxu1 %v298_v26 }
  0x1a   :  { %300 = vmatprep.subr.bf16.mxu1 %v309_v0 }
  0x1d   :  { %302 = vmatpush3.bf16.msra.mxu1 %v301_v29 }
  0x1e   :  { %303 = vmatprep.subr.bf16.mxu1 %v309_v0 }
  0x21   :  { %305 = vmatpush3.bf16.msra.mxu1 %v304_v32 }
  0xde   :  { %v102_v34 = vpop.f32.mrb[0].mxu0 }
  0xdf   :  { %v103_v35 = vadd.f32 %v205_v33, %v102_v34  ;;  %v240_v36 = vpop.f32.mrb[1].mxu0 }
  0xe1   :  { %v106_v37 = vmax.f32 %v103_v35, 0.0 }
  0xe3   :  { %274 = vmatmul.mubr.f32.vlgmr.msra.gmra.mrb[0].mxu1 %v106_v37 }
 0x1b6   :  { %v196_v39 = vpop.f32.mrb[0].mxu1 }
 0x1b7   :  { %v197_v40 = vadd.f32 %v207_v38, %v196_v39  ;;  %v275_v41 = vpop.f32.mrb[1].mxu1 }
 0x1b9   :  { %200 = vst [vmem:[%s419_s5] sm:$0xff] %v197_v40 }

</bundles_post_ra>
